<compile_context>
chip_gen: v5e
topology: v5e:2x2
jax: 0.10.0
libtpu: 0.0.40
codegen_flags: <defaults>
</compile_context>

<pallas_src>
import jax
import jax.numpy as jnp
from jax.experimental import pallas as pl
from jax.experimental.pallas import tpu as pltpu


def node_feature_kernel(m_ref, xt_ref, o_ref):
    """One d-tile: accumulate dot(sum_k M[:, tile], sum_n X[tile, :]) into SMEM."""
    # Accumulator init on the first d-tile (P3 pattern, reduction axis is the grid).
    @pl.when(pl.program_id(0) == 0)
    def _():
        o_ref[0, 0] = jnp.float32(0.0)

    # Both partial sums are sublane (axis=0) reductions; keepdims keeps them as
    # natural lane-major (1, d_tile) 2D rows (no 1-D relayout / hidden copies).
    # Cast to f32 first so accumulation is always f32, even for bf16 inputs.
    m_colsum = jnp.sum(m_ref[...].astype(jnp.float32), axis=0, keepdims=True)   # (1, td)
    x_colsum = jnp.sum(xt_ref[...].astype(jnp.float32), axis=0, keepdims=True)  # (1, td)

    # Length-td VPU multiply + reduce -> scalar, accumulated directly in SMEM.
    o_ref[0, 0] += jnp.sum(m_colsum * x_colsum)


def _choose_d_tile(k, n, d, itemsize, d_tile=None):
    """Pick a d-tile: whole-d if it fits comfortably, else lane-aligned chunks."""
    if d_tile is not None:
        assert d % d_tile == 0, "explicit d_tile must divide d"
        return d_tile
    # ~8 MiB of resident input tiles keeps 2x double-buffering well under the
    # 32 MiB scoped-VMEM default on v7x (tightest generation); v5e/v6e have more.
    budget = 8 * 1024 * 1024
    bytes_per_d_col = (k + n) * itemsize
    if d * bytes_per_d_col <= budget:
        return d                                  # single tile / single grid step
    td = max(128, (budget // bytes_per_d_col) // 128 * 128)
    td = min(td, d)
    while td > 128 and d % td != 0:               # need lane-aligned, even split
        td -= 128
    if d % td != 0:
        return d                                  # fallback: whole-d tile
    return td


def node_feature_forward(m1_1: jax.Array, x_c: jax.Array, *, d_tile=None) -> jax.Array:
    """Equivalent of Node_feature.forward.

    Returns a (1, 1) float32 array; call float(out[0, 0]) at the host if the
    PyTorch `.item()` (host-sync) semantics are needed.
    """
    k, d = m1_1.shape
    d2, n = x_c.shape
    assert d == d2, "inner dims must match"

    # (n, d): makes the X reduction a sublane reduction with the same lane-major
    # layout as M's partial sum (pure wrapper-side layout plumbing).
    x_t = x_c.T

    td = _choose_d_tile(k, n, d, jnp.dtype(m1_1.dtype).itemsize, d_tile)
    grid = (d // td,)

    return pl.pallas_call(
        node_feature_kernel,
        out_shape=jax.ShapeDtypeStruct((1, 1), jnp.float32),
        grid=grid,
        in_specs=[
            pl.BlockSpec((k, td), lambda j: (0, j)),   # M tile:  (k, td)
            pl.BlockSpec((n, td), lambda j: (0, j)),   # X^T tile:(n, td)
        ],
        out_specs=pl.BlockSpec((1, 1), lambda j: (0, 0),
                               memory_space=pltpu.MemorySpace.SMEM),
        compiler_params=pltpu.CompilerParams(
            dimension_semantics=("arbitrary",)),        # d is a reduction axis
    )(m1_1, x_t)


if __name__ == "__main__":
    key = jax.random.PRNGKey(0)
    k_m, k_x, k_m2, k_x2 = jax.random.split(key, 4)

    # Small, deterministic shapes consistent with the module: k=16, d=32, n=8.
    k_dim, d_dim, n_dim = 16, 32, 8
    m1_1 = jax.random.normal(k_m, (k_dim, d_dim), dtype=jnp.float32)
    x_c = jax.random.normal(k_x, (d_dim, n_dim), dtype=jnp.float32)

    # f32 path (single grid step).
    out = jax.block_until_ready(node_feature_forward(m1_1, x_c))
    ref = jnp.sum(m1_1 @ x_c)
    assert jnp.allclose(out[0, 0], ref, rtol=1e-4, atol=1e-3), (out, ref)

    # bf16 inputs: kernel still accumulates in f32 (in-kernel cast).
    m_bf = m1_1.astype(jnp.bfloat16)
    x_bf = x_c.astype(jnp.bfloat16)
    out_bf = jax.block_until_ready(node_feature_forward(m_bf, x_bf))
    ref_bf = jnp.sum(m_bf.astype(jnp.float32) @ x_bf.astype(jnp.float32))
    assert jnp.allclose(out_bf[0, 0], ref_bf, rtol=1e-2, atol=1e-2), (out_bf, ref_bf)

    # Exercise the multi-step d-grid accumulation path (d=256, two 128-wide tiles).
    d_big = 256
    m_big = jax.random.normal(k_m2, (k_dim, d_big), dtype=jnp.float32)
    x_big = jax.random.normal(k_x2, (d_big, n_dim), dtype=jnp.float32)
    out_big = jax.block_until_ready(node_feature_forward(m_big, x_big, d_tile=128))
    ref_big = jnp.sum(m_big @ x_big)
    assert jnp.allclose(out_big[0, 0], ref_big, rtol=1e-4, atol=1e-2), (out_big, ref_big)

    scalar_result = float(out[0, 0])  # mirrors .item(); host sync deferred to here
    print("KERNEL_OK")
</pallas_src>

<mosaic_0001>
module attributes {stable_mosaic.version = 11 : i64} {
  func.func @node_feature_kernel(%arg0: i32, %arg1: memref<16x32xf32, #tpu.memory_space<vmem>>, %arg2: memref<8x32xf32, #tpu.memory_space<vmem>>, %arg3: memref<1x1xf32, #tpu.memory_space<smem>>) attributes {dimension_semantics = [#tpu.dimension_semantics<arbitrary>], iteration_bounds = array<i64: 1>, scalar_prefetch = 0 : i64, scratch_operands = 0 : i64, tpu.core_type = #tpu.core_type<tc>, window_params = [{transform_indices = @transform_0, window_bounds = array<i64: 16, 32>}, {transform_indices = @transform_1, window_bounds = array<i64: 8, 32>}, {transform_indices = @transform_2, window_bounds = array<i64: 1, 1>}]} {
    %c0_i32 = arith.constant 0 : i32
    %0 = arith.cmpi eq, %arg0, %c0_i32 : i32
    %1 = arith.extui %0 : i1 to i32
    %c0_i32_0 = arith.constant 0 : i32
    %2 = arith.cmpi ne, %1, %c0_i32_0 : i32
    scf.if %2 {
      %cst_10 = arith.constant 0.000000e+00 : f32
      %c0_11 = arith.constant 0 : index
      %c0_12 = arith.constant 0 : index
      %17 = memref.load %arg3[%c0_11, %c0_12] : memref<1x1xf32, #tpu.memory_space<smem>>
      memref.store %cst_10, %arg3[%c0_11, %c0_12] : memref<1x1xf32, #tpu.memory_space<smem>>
    } else {
    }
    %c0 = arith.constant 0 : index
    %c0_1 = arith.constant 0 : index
    %3 = vector.load %arg1[%c0, %c0_1] : memref<16x32xf32, #tpu.memory_space<vmem>>, vector<16x32xf32>
    %cst = arith.constant dense<0.000000e+00> : vector<32xf32>
    %4 = vector.multi_reduction <add>, %3, %cst [0] : vector<16x32xf32> to vector<32xf32>
    %5 = vector.shape_cast %4 : vector<32xf32> to vector<1x32xf32>
    %c0_2 = arith.constant 0 : index
    %c0_3 = arith.constant 0 : index
    %6 = vector.load %arg2[%c0_2, %c0_3] : memref<8x32xf32, #tpu.memory_space<vmem>>, vector<8x32xf32>
    %cst_4 = arith.constant dense<0.000000e+00> : vector<32xf32>
    %7 = vector.multi_reduction <add>, %6, %cst_4 [0] : vector<8x32xf32> to vector<32xf32>
    %8 = vector.shape_cast %7 : vector<32xf32> to vector<1x32xf32>
    %c0_5 = arith.constant 0 : index
    %c0_6 = arith.constant 0 : index
    %9 = memref.load %arg3[%c0_5, %c0_6] : memref<1x1xf32, #tpu.memory_space<smem>>
    %10 = arith.mulf %5, %8 : vector<1x32xf32>
    %11 = vector.shape_cast %10 : vector<1x32xf32> to vector<1x1x32xf32>
    %cst_7 = arith.constant dense<0.000000e+00> : vector<1xf32>
    %12 = vector.multi_reduction <add>, %11, %cst_7 [1, 2] : vector<1x1x32xf32> to vector<1xf32>
    %13 = vector.shape_cast %12 : vector<1xf32> to vector<1x1x1xf32>
    %14 = vector.extract %13[0, 0, 0] : f32 from vector<1x1x1xf32>
    %15 = arith.addf %9, %14 : f32
    %c0_8 = arith.constant 0 : index
    %c0_9 = arith.constant 0 : index
    %16 = memref.load %arg3[%c0_8, %c0_9] : memref<1x1xf32, #tpu.memory_space<smem>>
    memref.store %15, %arg3[%c0_8, %c0_9] : memref<1x1xf32, #tpu.memory_space<smem>>
    return
  }
  func.func @transform_0(%arg0: i32) -> (i32, i32) {
    %c0_i32 = arith.constant 0 : i32
    %c0_i32_0 = arith.constant 0 : i32
    return %c0_i32, %arg0 : i32, i32
  }
  func.func @transform_1(%arg0: i32) -> (i32, i32) {
    %c0_i32 = arith.constant 0 : i32
    %c0_i32_0 = arith.constant 0 : i32
    return %c0_i32, %arg0 : i32, i32
  }
  func.func @transform_2(%arg0: i32) -> (i32, i32) {
    %c0_i32 = arith.constant 0 : i32
    %c0_i32_0 = arith.constant 0 : i32
    %c0_i32_1 = arith.constant 0 : i32
    return %c0_i32, %c0_i32_0 : i32, i32
  }
}

</mosaic_0001>

<bundles_post_ra>
// kernel: tpu_custom_call.1
= control target key start
LH: loop header
LB: loop body
LE: loop exit
PB: predicated region body
PF: predicated region fallthrough
CT: control target
= control target key end

     0   :  { %7 = vsyncpa [#allocation3], 0  ;;  %s204_s0 = inlined_call_operand.hbm [shape: f32[16,32], index: 0, kind: input, shape index: {}]   ;;  %s205_s1 = inlined_call_operand.hbm [shape: f32[8,32], index: 1, kind: input, shape index: {}]   ;;  %s206_s2 = inlined_call_operand.hbm [shape: f32[1,1], index: 2, kind: output, shape index: {}]  }
   0x1   :  { %8 = vsyncpa [#allocation6], 0 }
   0x2   :  { %9 = vsyncpa [#allocation4], 0  ;;  %s14_s11 = sshll.u32 %s204_s0, 4  ;;  %s175_s12 = smov [#allocation2]   ;;  %s15_s11 = int_to_ptr.hbm [resolvable:$true] %s14_s11 }
   0x3   :  { %s16_s13 = sshll.u32 %s175_s12, 4  ;;  %s28_s16 = sshll.u32 %s205_s1, 4  ;;  %s17_s13 = int_to_ptr.vmem [resolvable:$true] %s16_s13  ;;  %s29_s16 = int_to_ptr.hbm [resolvable:$true] %s28_s16 }
   0x4   :  { %s176_s17 = smov 128   ;;  %s177_s18 = smov 8  }
   0x5   :  { %22 = dma.hbm_to_vmem [thread:$0]  %s15_s11, 256, %s17_s13, [#allocation3], %s176_s17, %s176_s17, %s177_s18  }
   0x6   :  { %s178_s19 = smov [#allocation5]  }
   0x7   :  { %s30_s20 = sshll.u32 %s178_s19, 4  ;;  %s31_s20 = int_to_ptr.vmem [resolvable:$true] %s30_s20 }
   0x8   :  { %33 = dma.hbm_to_vmem [thread:$0]  %s29_s16, 128, %s31_s20, [#allocation6]  }
   0x9   :  { %169 = dma.done.wait [#allocation3], 256  }
   0xa   :  { %170 = vsyncadd [#allocation3], 4294967040 }
   0xb   :  { %171 = dma.done.wait [#allocation6], 128  }
   0xc   :  { %172 = vsyncadd [#allocation6], 4294967168  ;;  %vm50_vm0 = vcmask 261120   ;;  %v48_v0 = vld [vmem:[#allocation2] sm:$0xff]  ;;  %v49_v1 = vld [vmem:[#allocation2 + $0x8] sm:$0xff]  ;;  %vm70_vm1 = vcmask 253952  }
   0xd   :  { %v60_v2 = vld [vmem:[#allocation5] sm:$0xff]  ;;  %v51_v3 = vsel %vm50_vm0, %v48_v0, 0.0  ;;  %v52_v4 = vsel %vm50_vm0, %v49_v1, 0.0  ;;  %s89_s21 = sshll.u32 %s206_s2, 4  ;;  %s179_s23 = smov [#allocation7]   ;;  %s90_s21 = int_to_ptr.hbm [resolvable:$true] %s89_s21 }
   0xe   :  { %v61_v5 = vsel %vm50_vm0, %v60_v2, 0.0  ;;  %v53_v6 = vadd.f32 %v52_v4, %v51_v3 }
   0xf   :  { %v62_v7 = vrot.slane %v61_v5, 4 }
  0x10   :  { %v54_v8 = vrot.slane %v53_v6, 4 }
  0x11   :  { %v63_v9 = vadd.f32 %v62_v7, %v61_v5 }
  0x12   :  { %v55_v10 = vadd.f32 %v54_v8, %v53_v6 }
  0x13   :  { %v64_v11 = vrot.slane %v63_v9, 2 }
  0x14   :  { %v56_v12 = vrot.slane %v55_v10, 2 }
  0x15   :  { %v65_v13 = vadd.f32 %v64_v11, %v63_v9 }
  0x16   :  { %v57_v14 = vadd.f32 %v56_v12, %v55_v10 }
  0x17   :  { %v66_v15 = vrot.slane %v65_v13, 1 }
  0x18   :  { %v58_v16 = vrot.slane %v57_v14, 1 }
  0x19   :  { %v67_v17 = vadd.f32 %v66_v15, %v65_v13 }
  0x1a   :  { %v59_v18 = vadd.f32 %v58_v16, %v57_v14 }
  0x1c   :  { %v69_v19 = vmul.f32 %v67_v17, %v59_v18 }
  0x1e   :  { %v71_v20 = vsel %vm70_vm1, %v69_v19, 0.0 }
  0x1f   :  { %72 = vadd.xlane.f32.xlu0 %v71_v20 }
  0x92   :  { %v73_v21 = vpop.xlane.xlu0 %72 }
  0x93   :  { %v74_v22 = vrot.slane %v73_v21, 4 }
  0x95   :  { %v75_v23 = vadd.f32 %v74_v22, %v73_v21 }
  0x97   :  { %v76_v24 = vrot.slane %v75_v23, 2 }
  0x99   :  { %v77_v25 = vadd.f32 %v76_v24, %v75_v23 }
  0x9b   :  { %v78_v26 = vrot.slane %v77_v25, 1 }
  0x9d   :  { %v79_v27 = vadd.f32 %v78_v26, %v77_v25 }
  0x9f   :  { %101 = vpush %v79_v27 }
  0xd0   :  { %s102_s22 = spop %101 }
  0xd1   :  { %83 = sst [smem:[#allocation7]] %s102_s22 }
  0xd2   :  { %92 = dma.smem_to_hbm %s179_s23, 16, %s90_s21, [#allocation4]  }
  0xd3   :  { %173 = dma.done.wait [#allocation4], 16  }
  0xd4   :  { %174 = vsyncadd [#allocation4], 4294967280 }
  0xd5   :  { %97 = sfence }
  0xd6   :  { %98 = vsyncpa [#allocation3], 1 }
  0xd7   :  { %99 = vsyncpa [#allocation6], 1 }
  0xd8   :  { %100 = vsyncpa [#allocation4], 1 }

</bundles_post_ra>
